<compile_context>
chip_gen: v7x
topology: tpu7x:2x2x1
jax: 0.10.0
libtpu: 0.0.40
codegen_flags: <defaults>
</compile_context>

<pallas_src>
import math
import functools

import jax
import jax.numpy as jnp
from jax import lax
from jax.experimental import pallas as pl
from jax.experimental.pallas import tpu as pltpu


# ----------------------------------------------------------------------------
# Static helpers (identical math to AdaptivePadding.get_pad_shape)
# ----------------------------------------------------------------------------
def _to_2tuple(v):
    return v if isinstance(v, tuple) else (v, v)


def _get_pad_shape(input_hw, kernel_size, stride, dilation):
    input_h, input_w = input_hw
    kernel_h, kernel_w = kernel_size
    stride_h, stride_w = stride
    output_h = math.ceil(input_h / stride_h)
    output_w = math.ceil(input_w / stride_w)
    pad_h = max((output_h - 1) * stride_h + (kernel_h - 1) * dilation[0] + 1 - input_h, 0)
    pad_w = max((output_w - 1) * stride_w + (kernel_w - 1) * dilation[1] + 1 - input_w, 0)
    return pad_h, pad_w


def _round_up(v, m):
    return ((v + m - 1) // m) * m


# ----------------------------------------------------------------------------
# Kernels
# ----------------------------------------------------------------------------
def _pad_plane_kernel(x_ref, o_ref, *, H, W, top, left, bottom, right):
    """Whole-plane padding, direct region stores (each output element written once)."""
    Bb = x_ref.shape[0]
    dt = x_ref.dtype
    W_out = left + W + right
    if top > 0:
        o_ref[:, :top, :] = jnp.zeros((Bb, top, W_out), dt)
    if bottom > 0:
        o_ref[:, top + H:, :] = jnp.zeros((Bb, bottom, W_out), dt)
    if left > 0:
        o_ref[:, top:top + H, :left] = jnp.zeros((Bb, H, left), dt)
    if right > 0:
        o_ref[:, top:top + H, left + W:] = jnp.zeros((Bb, H, right), dt)
    o_ref[:, top:top + H, left:left + W] = x_ref[...]


def _pad_rows_flat_kernel(x_ref, o_ref, *, top_elems, body_elems):
    """Height-only padding on planes flattened to (B, H*W): lane-dense stores."""
    Bb = x_ref.shape[0]
    dt = x_ref.dtype
    if top_elems > 0:
        o_ref[:, :top_elems] = jnp.zeros((Bb, top_elems), dt)
    o_ref[:, top_elems:top_elems + body_elems] = x_ref[...]
    tail = o_ref.shape[1] - top_elems - body_elems
    if tail > 0:
        o_ref[:, top_elems + body_elems:] = jnp.zeros((Bb, tail), dt)


def _pad_htiled_kernel(x_ref, o_ref, *, H, W, th, left, right):
    """H-tiled padding for planes too large for one VMEM block (requires top == 0).

    Each step handles rows [j*th, (j+1)*th) of the padded output.  Rows >= H are
    bottom padding and are zeroed via a row mask; pad columns are zeroed strips.
    """
    j = pl.program_id(1)
    Bb = x_ref.shape[0]
    dt = x_ref.dtype
    x = x_ref[...]                                                   # (Bb, th, W)
    row = j * th + lax.broadcasted_iota(jnp.int32, x.shape, 1)
    x = jnp.where(row < H, x, 0)                                     # zero bottom-pad rows
    if left > 0:
        o_ref[:, :, :left] = jnp.zeros((Bb, th, left), dt)
    o_ref[:, :, left:left + W] = x
    if right > 0:
        o_ref[:, :, left + W:] = jnp.zeros((Bb, th, right), dt)


# ----------------------------------------------------------------------------
# Sizing constants (per perf review: small tiles saturate HBM, leave VMEM slack)
# ----------------------------------------------------------------------------
_BLOCK_VMEM_BUDGET = 4 * 1024 * 1024    # per-step (input block + output block) bytes
_VMEM_LIMIT_BYTES = 16 * 1024 * 1024    # <= v5e default scoped VMEM; ample for 2x buffering
_MIN_GRID_STEPS = 8                     # let v7x megacore load-balance across 2 TCs


def _choose_batch(nc, plane_bytes):
    b_budget = max(1, _BLOCK_VMEM_BUDGET // plane_bytes)
    b_steps = max(1, pl.cdiv(nc, _MIN_GRID_STEPS))
    return max(1, min(b_budget, b_steps, nc))


def _compiler_params(semantics):
    return pltpu.CompilerParams(dimension_semantics=semantics,
                                vmem_limit_bytes=_VMEM_LIMIT_BYTES)


# ----------------------------------------------------------------------------
# Public wrapper (AdaptivePadding.forward equivalent, NCHW)
# ----------------------------------------------------------------------------
def adaptive_padding(x, kernel_size=1, stride=1, dilation=1, padding="corner"):
    assert padding in ("same", "corner")
    kernel_size = _to_2tuple(kernel_size)
    stride = _to_2tuple(stride)
    dilation = _to_2tuple(dilation)

    N, C, H, W = x.shape
    pad_h, pad_w = _get_pad_shape((H, W), kernel_size, stride, dilation)

    # Fast path: already aligned -> no kernel launch, no HBM round trip.
    if pad_h == 0 and pad_w == 0:
        return x

    H_out, W_out = H + pad_h, W + pad_w
    if padding == "corner":
        top, left = 0, 0
    else:                               # "same": F.pad puts the extra pixel bottom/right
        top, left = pad_h // 2, pad_w // 2
    bottom, right = pad_h - top, pad_w - left

    NC = N * C
    itemsize = jnp.dtype(x.dtype).itemsize
    plane_bytes = (H * W + H_out * W_out) * itemsize
    cost = pl.CostEstimate(flops=0, transcendentals=0,
                           bytes_accessed=NC * plane_bytes)

    # ---- Path A: height-only padding -> lane-dense flattened stores ----------
    if pad_w == 0 and min(8, NC) * plane_bytes <= _BLOCK_VMEM_BUDGET:
        if NC < 8:
            B = NC                                    # block == full dim (no sublane constraint)
        else:
            B = max(8, (_choose_batch(NC, plane_bytes) // 8) * 8)  # sublane-aligned block
        x_flat = x.reshape(NC, H * W)
        kernel = functools.partial(_pad_rows_flat_kernel,
                                   top_elems=top * W, body_elems=H * W)
        out = pl.pallas_call(
            kernel,
            out_shape=jax.ShapeDtypeStruct((NC, H_out * W_out), x.dtype),
            grid=(pl.cdiv(NC, B),),
            in_specs=[pl.BlockSpec((B, H * W), lambda i: (i, 0))],
            out_specs=pl.BlockSpec((B, H_out * W_out), lambda i: (i, 0)),
            compiler_params=_compiler_params(("parallel",)),
            cost_estimate=cost,
        )(x_flat)
        return out.reshape(N, C, H_out, W_out)

    # ---- Path B: whole-plane blocks, direct region stores --------------------
    if plane_bytes <= _BLOCK_VMEM_BUDGET:
        B = _choose_batch(NC, plane_bytes)
        x_flat = x.reshape(NC, H, W)
        kernel = functools.partial(_pad_plane_kernel, H=H, W=W,
                                   top=top, left=left, bottom=bottom, right=right)
        out = pl.pallas_call(
            kernel,
            out_shape=jax.ShapeDtypeStruct((NC, H_out, W_out), x.dtype),
            grid=(pl.cdiv(NC, B),),
            # Last two block dims equal the full array dims -> no (8,128) constraint.
            in_specs=[pl.BlockSpec((B, H, W), lambda i: (i, 0, 0))],
            out_specs=pl.BlockSpec((B, H_out, W_out), lambda i: (i, 0, 0)),
            compiler_params=_compiler_params(("parallel",)),
            cost_estimate=cost,
        )(x_flat)
        return out.reshape(N, C, H_out, W_out)

    # ---- Path C: large planes -> H-tiled kernel (top == 0 covers 'corner' and
    #      'same' with pad_h < 2; row tiles aligned to the sublane packing). ----
    row_align = 8 * max(1, 4 // itemsize)             # 8 f32 / 16 bf16 / 32 int8
    row_bytes = (W + W_out) * itemsize
    if top == 0 and row_align * row_bytes <= _BLOCK_VMEM_BUDGET:
        th = max(row_align,
                 (_BLOCK_VMEM_BUDGET // row_bytes) // row_align * row_align)
        th = min(th, _round_up(H_out, row_align))
        n_h_out = pl.cdiv(H_out, th)
        n_h_in = pl.cdiv(H, th)
        x_flat = x.reshape(NC, H, W)
        kernel = functools.partial(_pad_htiled_kernel, H=H, W=W, th=th,
                                   left=left, right=right)
        out = pl.pallas_call(
            kernel,
            out_shape=jax.ShapeDtypeStruct((NC, H_out, W_out), x.dtype),
            grid=(NC, n_h_out),
            # Clamp the input block index so bottom-pad tiles never index past H.
            in_specs=[pl.BlockSpec((1, th, W),
                                   lambda i, j: (i, jnp.minimum(j, n_h_in - 1), 0))],
            out_specs=pl.BlockSpec((1, th, W_out), lambda i, j: (i, j, 0)),
            compiler_params=_compiler_params(("parallel", "parallel")),
            cost_estimate=cost,
        )(x_flat)
        return out.reshape(N, C, H_out, W_out)

    # TODO(synk): Pallas path for huge planes with 'same' padding and top > 0
    # (needs an H-shifted windowed copy); defer that rare case to XLA pad.
    return jnp.pad(x, ((0, 0), (0, 0), (top, bottom), (left, right)))


# ----------------------------------------------------------------------------
# Self-test
# ----------------------------------------------------------------------------
if __name__ == "__main__":
    key = jax.random.PRNGKey(0)
    k1, k2, k3, k4 = jax.random.split(key, 4)

    def ref_pad(xt, mode):
        Hh, Ww = xt.shape[-2:]
        ph, pw = _get_pad_shape((Hh, Ww), (16, 16), (16, 16), (1, 1))
        if mode == "corner":
            t = l = 0
        else:
            t, l = ph // 2, pw // 2
        return jnp.pad(xt, ((0, 0), (0, 0), (t, ph - t), (l, pw - l)))

    # 1) Docstring example shapes, both modes (whole-plane kernel, Path B).
    x = jax.random.normal(k1, (2, 4, 15, 17), dtype=jnp.float32)
    out_corner = adaptive_padding(x, 16, 16, 1, "corner")
    out_same = adaptive_padding(x, 16, 16, 1, "same")
    assert out_corner.shape == (2, 4, 16, 32), out_corner.shape
    assert out_same.shape == (2, 4, 16, 32), out_same.shape
    assert jnp.array_equal(out_corner, ref_pad(x, "corner"))
    assert jnp.array_equal(out_same, ref_pad(x, "same"))

    # 2) Already aligned: fast path returns the input unchanged.
    x2 = jax.random.normal(k2, (2, 4, 16, 16), jnp.float32)
    out2 = adaptive_padding(x2, 16, 16, 1, "corner")
    assert out2.shape == (2, 4, 16, 16)
    assert jnp.array_equal(out2, x2)

    # 3) Height-only padding -> lane-dense flattened kernel (Path A).
    x3 = jax.random.normal(k3, (2, 4, 14, 128), jnp.float32)
    out3c = adaptive_padding(x3, 16, 16, 1, "corner")
    out3s = adaptive_padding(x3, 16, 16, 1, "same")
    assert out3c.shape == (2, 4, 16, 128)
    assert jnp.array_equal(out3c, ref_pad(x3, "corner"))
    assert jnp.array_equal(out3s, ref_pad(x3, "same"))

    # 4) Large plane (one plane > block budget) -> H-tiled kernel (Path C).
    x4 = jax.random.normal(k4, (1, 1, 1000, 1030), jnp.float32)
    out4 = adaptive_padding(x4, 16, 16, 1, "corner")
    assert out4.shape == (1, 1, 1008, 1040), out4.shape
    assert jnp.array_equal(out4, ref_pad(x4, "corner"))

    jax.block_until_ready((out_corner, out_same, out2, out3c, out3s, out4))
    print("KERNEL_OK")
</pallas_src>

<mosaic_0001>
module attributes {stable_mosaic.version = 11 : i64} {
  func.func @_pad_plane_kernel(%arg0: i32, %arg1: memref<1x15x17xf32, #tpu.memory_space<vmem>>, %arg2: memref<1x16x32xf32, #tpu.memory_space<vmem>>) attributes {dimension_semantics = [#tpu.dimension_semantics<parallel>], iteration_bounds = array<i64: 8>, scalar_prefetch = 0 : i64, scratch_operands = 0 : i64, tpu.core_type = #tpu.core_type<tc>, window_params = [{transform_indices = @transform_0, window_bounds = array<i64: 1, 15, 17>}, {transform_indices = @transform_1, window_bounds = array<i64: 1, 16, 32>}]} {
    %cst = arith.constant 0.000000e+00 : f32
    %0 = vector.broadcast %cst : f32 to vector<1x1x32xf32>
    %c0 = arith.constant 0 : index
    %c15 = arith.constant 15 : index
    %c0_0 = arith.constant 0 : index
    %1 = vector.load %arg2[%c0, %c15, %c0_0] : memref<1x16x32xf32, #tpu.memory_space<vmem>>, vector<1x1x32xf32>
    tpu.vector_store %arg2[%c0, %c15, %c0_0], %0 {strides = array<i32>} : memref<1x16x32xf32, #tpu.memory_space<vmem>>, vector<1x1x32xf32>,
    %cst_1 = arith.constant 0.000000e+00 : f32
    %2 = vector.broadcast %cst_1 : f32 to vector<1x15x15xf32>
    %c0_2 = arith.constant 0 : index
    %c0_3 = arith.constant 0 : index
    %c17 = arith.constant 17 : index
    %3 = vector.load %arg2[%c0_2, %c0_3, %c17] : memref<1x16x32xf32, #tpu.memory_space<vmem>>, vector<1x15x15xf32>
    tpu.vector_store %arg2[%c0_2, %c0_3, %c17], %2 {strides = array<i32>} : memref<1x16x32xf32, #tpu.memory_space<vmem>>, vector<1x15x15xf32>,
    %c0_4 = arith.constant 0 : index
    %c0_5 = arith.constant 0 : index
    %c0_6 = arith.constant 0 : index
    %4 = vector.load %arg1[%c0_4, %c0_5, %c0_6] : memref<1x15x17xf32, #tpu.memory_space<vmem>>, vector<1x15x17xf32>
    %c0_7 = arith.constant 0 : index
    %c0_8 = arith.constant 0 : index
    %c0_9 = arith.constant 0 : index
    %5 = vector.load %arg2[%c0_7, %c0_8, %c0_9] : memref<1x16x32xf32, #tpu.memory_space<vmem>>, vector<1x15x17xf32>
    tpu.vector_store %arg2[%c0_7, %c0_8, %c0_9], %4 {strides = array<i32>} : memref<1x16x32xf32, #tpu.memory_space<vmem>>, vector<1x15x17xf32>,
    return
  }
  func.func @transform_0(%arg0: i32) -> (i32, i32, i32) {
    %c0_i32 = arith.constant 0 : i32
    %c0_i32_0 = arith.constant 0 : i32
    %c0_i32_1 = arith.constant 0 : i32
    return %arg0, %c0_i32, %c0_i32_0 : i32, i32, i32
  }
  func.func @transform_1(%arg0: i32) -> (i32, i32, i32) {
    %c0_i32 = arith.constant 0 : i32
    %c0_i32_0 = arith.constant 0 : i32
    %c0_i32_1 = arith.constant 0 : i32
    return %arg0, %c0_i32, %c0_i32_0 : i32, i32, i32
  }
}

</mosaic_0001>

<bundles_post_ra>
// kernel: tpu_custom_call.1
= control target key start
LH: loop header
LB: loop body
LE: loop exit
PB: predicated region body
PF: predicated region fallthrough
CT: control target
= control target key end

     0   :  { %6 = vsyncpa [#allocation3], 0  ;;  %s440_s0 = inlined_call_operand.vmem [shape: f32[8,15,17], index: 0, kind: input, shape index: {}]   ;;  %s441_s1 = inlined_call_operand.hbm [shape: f32[8,16,32], index: 1, kind: output, shape index: {}]  }
   0x1   :  { %8 = vsyncpa [#allocation3 + $0x1], 0  ;;  %s337_s6 = smov 0   ;;  %s339_s7 = smov 0  }
   0x2   :  { %s341_s8 = smov 0   ;;  %s343_s9 = smov 0  }
   0x3 LB: > { %s358_s10 = sadd.s32 4294967295, %s321_s9   ;;  %s203_s11 = sadd.s32 4294967294, %s321_s9   ;;  %s321_s9 = sphi %s343_s9, %s447_s9   ;;  %s317_s8 = sphi %s341_s8, %s446_s8   ;;  %s313_s7 = sphi %s339_s7, %s445_s7   ;;  %s309_s6 = sphi %s337_s6, %s444_s6  }
   0x4   : > { %s362_s12 = sadd.s32 1, %s321_s9   ;;  %s47_s13 = sadd.s32 1, %s317_s8 }
   0x5   : > { %s44_s14 = ssub.s32 %s321_s9, %s362_s12  ;;  %p57_p0 = scmp.ne.s32.totalorder %s317_s8, %s313_s7 }
   0x6   : > { %p45_p1 = scmp.eq.s32.totalorder %s44_s14, 0  ;;  %p58_p2 = scmp.eq.s32.totalorder %s358_s10, 7 }
   0x7   : > { %p63_p3 = scmp.ne.s32.totalorder %s313_s7, %s309_s6  ;;  %p64_p4 = scmp.eq.s32.totalorder %s203_s11, 7 }
   0x8   : > { %s373_s15 = scalar_select %p45_p1, %s317_s8, %s47_s13  }
   0x9   : > { %p375_p5 = por %p58_p2, %p57_p0  ;;  %p379_p6 = por %p64_p4, %p63_p3 }
   0xa   : > { %p206_p7 = scmp.ge.s32.totalorder %s321_s9, 1  ;;  %p90_p8 = scmp.lt.s32.totalorder %s321_s9, 9 }
   0xc   : > { %p91_p9 = pnand %p206_p7, %p90_p8 }
   0xd   : > { %s107_s18 = sand.u32 (!%p91_p9), 1, %s313_s7   ;;  %vm117_vm0 = vcmask (!%p91_p9), 261256   ;;  %vm119_vm1 = vcmask (!%p91_p9), 260232   ;;  %vm115_vm2 = vcmask (!%p91_p9), 253952   ;;  %p110_p10 = scmp.lt.s32.totalorder (!%p91_p9), %s358_s10, 7  ;;  %v323_v0 = vmov (!%p91_p9), 0.0  }
   0xe   : > { %94 = sbr.rel (%p91_p9) target bundleno = 43 (0x2b), region = 24  ;;  %s207_s19 = sshll.u32 (!%p91_p9), %s107_s18, 4  ;;  %vm123_vm3 = vcmask (!%p91_p9), 138240   ;;  %vm125_vm4 = vcmask (!%p91_p9), 137216  }
   0xf   : > { %s216_s20 = sshll.u32 (!%p91_p9), %s358_s10, 8  ;;  %s109_s21 = scalar_lea.vmem (!%p91_p9), [#allocation2], %s207_s19 }
  0x10   : > { %118 = vst.msk [vmem:[%s109_s21] sm:$0xff] (!%p91_p9), %vm117_vm0, %v323_v0  ;;  %s392_s24 = scalar_lea.hbm (!%p91_p9), %s441_s1, %s216_s20  ;;  %s141_s25 = sshll.u32 (!%p91_p9), %s109_s21, 4  ;;  %s394_s25 = int_to_ptr.vmem [resolvable:$true] %s141_s25 }
  0x11   : > { %120 = vst.msk [vmem:[%s109_s21 + $0x8] sm:$0x7f] (!%p91_p9), %vm119_vm1, %v323_v0  ;;  %s399_s30 = scalar_lea.sflag (!%p91_p9), [#allocation3], %s107_s18  ;;  %s259_s2 = scalar_lea.vmem (!%p91_p9), %s394_s25, 256 }
  0x12   : > { %116 = vst.msk [vmem:[%s109_s21 + $0xf] sm:$0x1] (!%p91_p9), %vm115_vm2, %v323_v0  ;;  %p260_p11 = scmp.ne.s32.totalorder (!%p91_p9), %s394_s25, %s259_s2  ;;  %s324_s3 = smov (!%p91_p9), [#allocation2]  }
  0x13   : > { %s263_s4 = sshll.u32 (!%p91_p9), %s324_s3, 4  ;;  %s264_s4 = int_to_ptr.vmem [resolvable:$false] %s263_s4 }
  0x14   : > { %p261_p12 = pnand (!%p91_p9), %p260_p11, %p375_p5  ;;  %s265_s5 = scalar_lea.vmem (!%p91_p9), %s264_s4, 512 }
  0x15   : > { %s449_s10 = smov (!%p110_p10, %s358_s10), 7  ;;  %p266_p0 = scmp.lt.s32.totalorder %s394_s25, %s264_s4 }
  0x16   : > { %s215_s26 = sshll.u32 %s449_s10, 4  ;;  %p262_p13 = pneg %p261_p12 }
  0x17   : > { %s114_s29 = scalar_lea.vmem %s440_s0, %s215_s26  ;;  %p267_p1 = scmp.lt.s32.totalorder %s265_s5, %s259_s2 }
  0x18   : > { %v121_v1 = vld [vmem:[%s114_s29] sm:$0xff]  ;;  %v122_v2 = vld [vmem:[%s114_s29 + $0x8] sm:$0x7f] }
  0x19   : > { %124 = vst.msk [vmem:[%s109_s21] sm:$0xff] %vm123_vm3, %v121_v1  ;;  %p268_p2 = por %p267_p1, %p266_p0 }
  0x1a   : > { %126 = vst.msk [vmem:[%s109_s21 + $0x8] sm:$0x7f] %vm125_vm4, %v122_v2 }
  0x1b   : > { %p269_p3 = pnand %p268_p2, %p262_p13 }
  0x1d   : > { %272 = shalt.err (!%p269_p3)
}
  0x1e   : > { %s273_s10 = scalar_lea.hbm %s392_s24, 256  ;;  %s277_s14 = scalar_lea.hbm %s441_s1, 2048 }
  0x1f   : > { %p274_p4 = scmp.ne.s32.totalorder %s392_s24, %s273_s10  ;;  %p278_p9 = scmp.lt.u32.totalorder %s392_s24, %s441_s1 }
  0x20   : > { %p279_p10 = scmp.lt.u32.totalorder %s277_s14, %s273_s10  ;;  %p281_p12 = scmp.lt.u32.totalorder %s273_s10, %s392_s24 }
  0x21   : > { %p275_p7 = pnand %p274_p4, %p375_p5 }
  0x22   : > { %p280_p11 = por %p279_p10, %p278_p9 }
  0x23   : > { %p276_p8 = pneg %p275_p7 }
  0x24   : > { %p282_p13 = por %p281_p12, %p280_p11 }
  0x26   : > { %p283_p0 = pnand %p282_p13, %p276_p8 }
  0x28   : > { %286 = shalt.err (!%p283_p0)
}
  0x29   : > { %s325_s20 = smov 128   ;;  %s326_s21 = smov 8  }
  0x2a   : > { %217 = dma.vmem_to_hbm [thread:$0]  (%p375_p5), %s394_s25, 256, %s392_s24, %s399_s30, %s325_s20, %s325_s20, %s326_s21  }
  0x2b PF: > { %p223_p1 = scmp.ge.s32.totalorder %s321_s9, 2  ;;  %s156_s22 = sand.u32 1, %s309_s6  }
  0x2c   : > { %s157_s23 = scalar_lea.sflag [#allocation3], %s156_s22 }
  0x2d   : > { %p220_p2 = pnand %p223_p1, %p379_p6 }
  0x2f   : > { %304 = dma.done.wait (!%p220_p2), %s157_s23, 256  }
  0x30   : > { %306 = vsyncadd (!%p220_p2), %s157_s23, 4294967040  ;;  %p11_p3 = scmp.ge.s32.totalorder %s362_s12, 10   ;;  %s444_s6 = smov %s313_s7 }
  0x31   : > { %s445_s7 = smov %s317_s8  ;;  %s446_s8 = smov %s373_s15 }
  0x32   : > { %s447_s9 = smov %s362_s12  ;;  %13 = sbr.rel (!%p11_p3) target bundleno = 3 (0x3), region = 59 }
  0x39   :  { %162 = vsyncpa [#allocation3], 1 }
  0x3a   :  { %164 = vsyncpa [#allocation3 + $0x1], 1 }

</bundles_post_ra>
